<compile_context>
chip_gen: v5e
topology: v5e:2x2
jax: 0.10.0
libtpu: 0.0.40
codegen_flags: <defaults>
</compile_context>

<pallas_src>
import functools
import math

import jax
import jax.numpy as jnp
from jax import lax
from jax.experimental import pallas as pl
from jax.experimental.pallas import tpu as pltpu

N_MIXTURES = 2
PIS = tuple(1.0 / N_MIXTURES for _ in range(N_MIXTURES))
SIGMAS = tuple(math.exp(-0) for _ in range(N_MIXTURES))  # exp(-0) == 1.0 per module
LOG_SQRT_2PI = math.log(math.sqrt(2.0 * math.pi))

# The closed-form prior below is exact only because every mixture sigma is 1.0
# and the mixture weights sum to 1 (as hard-coded in the original module).
assert all(s == 1.0 for s in SIGMAS) and abs(sum(PIS) - 1.0) < 1e-12


def _softplus(x):
    # numerically stable log1p(exp(x)); same EUP cost as the naive form
    return jnp.maximum(x, 0.0) + jnp.log1p(jnp.exp(-jnp.abs(x)))


def _round_up(x, m):
    return ((x + m - 1) // m) * m


def _lane_fold(c):
    """(R, C) -> (R, 128): sum 128-lane groups with aligned VPU adds only."""
    cdim = c.shape[1]
    out = c[:, 0:128]
    for t in range(1, cdim // 128):
        out = out + c[:, t * 128:(t + 1) * 128]
    return out


def _bayesian_linear_kernel(
    x_ref, wmu_ref, wrho_ref, weps_ref, bmu_ref, brho_ref, beps_ref,   # inputs
    out_ref, lp_ref, lvp_ref,                                          # outputs
    acc_y, acc_lp, acc_lvp,                                            # scratch
    *, in_features, out_features, tk, to, mask_rows, mask_cols,
):
    j = pl.program_id(0)                 # out_features tile (parallel)
    k = pl.program_id(1)                 # in_features tile (reduction)
    nk = pl.num_programs(1)

    @pl.when(k == 0)
    def _init():
        acc_y[...] = jnp.zeros_like(acc_y)
        acc_lp[...] = jnp.zeros_like(acc_lp)
        acc_lvp[...] = jnp.zeros_like(acc_lvp)

    # --- reparameterized weight sample (VPU + EUP), already (in, out) layout ---
    mu = wmu_ref[...]                    # (tk, to)
    rho = wrho_ref[...]
    eps = weps_ref[...]
    sigma = _softplus(rho)
    w = mu + sigma * eps

    # --- matmul partial product on the MXU (no transpose) ---
    acc_y[...] += jnp.dot(x_ref[...], w, preferred_element_type=jnp.float32)

    # --- per-element log-prob contributions (closed forms, see header) ---
    lp_c = (-LOG_SQRT_2PI) - 0.5 * (w * w)
    lvp_c = (-LOG_SQRT_2PI) - jnp.log(sigma) - 0.5 * (eps * eps)

    if mask_rows or mask_cols:           # padded tail elements contribute nothing
        valid = None
        if mask_rows:
            rows = lax.broadcasted_iota(jnp.int32, (tk, to), 0) + k * tk
            valid = rows < in_features
        if mask_cols:
            cols = lax.broadcasted_iota(jnp.int32, (tk, to), 1) + j * to
            cmask = cols < out_features
            valid = cmask if valid is None else (valid & cmask)
        lp_c = jnp.where(valid, lp_c, 0.0)
        lvp_c = jnp.where(valid, lvp_c, 0.0)

    # lane-group fold keeps the per-step reduction on the VPU (no XLU work)
    acc_lp[...] += _lane_fold(lp_c)
    acc_lvp[...] += _lane_fold(lvp_c)

    # --- finalize on the last reduction step ---
    @pl.when(k == nk - 1)
    def _finalize():
        bmu = bmu_ref[...]               # (1, to)
        brho = brho_ref[...]
        beps = beps_ref[...]
        bsigma = _softplus(brho)
        b = bmu + bsigma * beps

        out_ref[...] = (acc_y[...] + b).astype(out_ref.dtype)

        b_lp = (-LOG_SQRT_2PI) - 0.5 * (b * b)
        b_lvp = (-LOG_SQRT_2PI) - jnp.log(bsigma) - 0.5 * (beps * beps)
        if mask_cols:
            bcols = lax.broadcasted_iota(jnp.int32, (1, to), 1) + j * to
            bvalid = bcols < out_features
            b_lp = jnp.where(bvalid, b_lp, 0.0)
            b_lvp = jnp.where(bvalid, b_lvp, 0.0)

        # single sublane reduction per out-tile; lane-dense (1,128) row outputs
        lp_row = jnp.sum(acc_lp[...], axis=0, keepdims=True) + _lane_fold(b_lp)
        lvp_row = jnp.sum(acc_lvp[...], axis=0, keepdims=True) + _lane_fold(b_lvp)
        lp_ref[...] = lp_row.reshape(1, 1, 128)
        lvp_ref[...] = lvp_row.reshape(1, 1, 128)


class BayesianLinearPallas:
    """JAX/Pallas port of BLOX BayesianLinear (forward pass)."""

    # Preferred f32 tile sizes. 3 double-buffered (TK, TO) weight streams are
    # ~3 MiB at (512, 256) -> safe on v7x's 64 MiB VMEM while keeping the
    # output lane-dense (TO multiple of 128) and HBM streams pipelined.
    _PREF_TK = 512   # in_features tile (reduction axis)
    _PREF_TO = 256   # out_features tile (parallel axis)

    def __init__(self, in_features, out_features, key, n_mixtures=2):
        assert n_mixtures == N_MIXTURES
        self.in_features = in_features
        self.out_features = out_features

        k1, k2, k3, k4 = jax.random.split(key, 4)
        # logical parameters in the torch layout (out, in) / (out,)
        self.weight_mu = jax.random.uniform(
            k1, (out_features, in_features), jnp.float32, minval=-0.2, maxval=0.2)
        self.weight_rho = jax.random.uniform(
            k2, (out_features, in_features), jnp.float32, minval=-5.0, maxval=-4.0)
        self.bias_mu = jax.random.uniform(
            k3, (out_features,), jnp.float32, minval=-0.2, maxval=0.2)
        self.bias_rho = jax.random.uniform(
            k4, (out_features,), jnp.float32, minval=-5.0, maxval=-4.0)

        # --- one-time layout plumbing: transpose to (in, out), pad to tiles ---
        i_pad0 = _round_up(in_features, 128)
        o_pad0 = _round_up(out_features, 128)
        self._tk = min(self._PREF_TK, i_pad0)
        self._to = min(self._PREF_TO, o_pad0)
        self._i_pad = _round_up(i_pad0, self._tk)
        self._o_pad = _round_up(o_pad0, self._to)
        self._n_k = self._i_pad // self._tk
        self._n_o = self._o_pad // self._to

        def pad_t(p):   # (O, I) -> (I_pad, O_pad)
            pt = jnp.transpose(p)
            return jnp.pad(pt, ((0, self._i_pad - in_features),
                                (0, self._o_pad - out_features)))

        def pad_b(p):   # (O,) -> (1, O_pad)
            return jnp.pad(p, (0, self._o_pad - out_features)).reshape(1, self._o_pad)

        self._wmu_t = pad_t(self.weight_mu)
        self._wrho_t = pad_t(self.weight_rho)
        self._bmu_p = pad_b(self.bias_mu)
        self._brho_p = pad_b(self.bias_rho)

        self.training = True
        self.log_prior = 0
        self.log_variational_posterior = 0

    # TODO(synk): generate eps in-kernel with pltpu.prng_seed/prng_random_bits
    # (or pltpu.stateful_normal) to drop the third (I, O) HBM stream (~33% of
    # weight-side traffic); kept host-side here so the RNG stays jax.random-
    # reproducible and the demo can verify against a plain-JAX reference.
    def _draw_eps(self, key):
        kw, kb = jax.random.split(key)
        eps_w = jax.random.normal(kw, (self._i_pad, self._o_pad), jnp.float32)
        eps_b = jax.random.normal(kb, (1, self._o_pad), jnp.float32)
        return eps_w, eps_b

    def __call__(self, x, key, sample=False, calculate_log_probs=False):
        B = x.shape[0]
        b_pad = _round_up(B, 8)
        i_pad, o_pad = self._i_pad, self._o_pad
        tk, to = self._tk, self._to
        n_k, n_o = self._n_k, self._n_o

        if self.training or sample:
            eps_w, eps_b = self._draw_eps(key)
        else:
            # eps == 0  =>  sampled value collapses exactly to mu (eval path)
            eps_w = jnp.zeros((i_pad, o_pad), jnp.float32)
            eps_b = jnp.zeros((1, o_pad), jnp.float32)

        x_p = jnp.pad(x.astype(jnp.float32),
                      ((0, b_pad - B), (0, i_pad - self.in_features)))

        kernel = functools.partial(
            _bayesian_linear_kernel,
            in_features=self.in_features, out_features=self.out_features,
            tk=tk, to=to,
            mask_rows=(i_pad != self.in_features),
            mask_cols=(o_pad != self.out_features),
        )

        y_p, lp_part, lvp_part = pl.pallas_call(
            kernel,
            out_shape=(
                jax.ShapeDtypeStruct((b_pad, o_pad), jnp.float32),
                jax.ShapeDtypeStruct((n_o, 1, 128), jnp.float32),
                jax.ShapeDtypeStruct((n_o, 1, 128), jnp.float32),
            ),
            grid=(n_o, n_k),
            in_specs=[
                pl.BlockSpec((b_pad, tk), lambda j, k: (0, k)),     # x
                pl.BlockSpec((tk, to), lambda j, k: (k, j)),        # weight mu (I,O)
                pl.BlockSpec((tk, to), lambda j, k: (k, j)),        # weight rho
                pl.BlockSpec((tk, to), lambda j, k: (k, j)),        # weight eps
                pl.BlockSpec((1, to), lambda j, k: (0, j)),         # bias mu
                pl.BlockSpec((1, to), lambda j, k: (0, j)),         # bias rho
                pl.BlockSpec((1, to), lambda j, k: (0, j)),         # bias eps
            ],
            out_specs=(
                pl.BlockSpec((b_pad, to), lambda j, k: (0, j)),     # y
                pl.BlockSpec((1, 1, 128), lambda j, k: (j, 0, 0)),  # log-prior rows
                pl.BlockSpec((1, 1, 128), lambda j, k: (j, 0, 0)),  # log-q rows
            ),
            scratch_shapes=[
                pltpu.VMEM((b_pad, to), jnp.float32),   # y accumulator
                pltpu.VMEM((tk, 128), jnp.float32),     # log-prior accumulator
                pltpu.VMEM((tk, 128), jnp.float32),     # log-q accumulator
            ],
            compiler_params=pltpu.CompilerParams(
                dimension_semantics=("parallel", "arbitrary"),
                vmem_limit_bytes=32 * 1024 * 1024,
            ),
        )(x_p, self._wmu_t, self._wrho_t, eps_w,
          self._bmu_p, self._brho_p, eps_b)

        y = y_p[:B, :self.out_features]

        if self.training or calculate_log_probs:
            self.log_prior = jnp.sum(lp_part)
            self.log_variational_posterior = jnp.sum(lvp_part)
        else:
            self.log_prior, self.log_variational_posterior = (0, 0)
        return y


def _reference_forward(layer, x, eps_w_p, eps_b_p):
    """Plain-JAX reference using the same eps draw (padded regions ignored)."""
    I, O = layer.in_features, layer.out_features
    mu_t = jnp.transpose(layer.weight_mu)          # (I, O)
    rho_t = jnp.transpose(layer.weight_rho)
    eps_w = eps_w_p[:I, :O]
    eps_b = eps_b_p[0, :O]
    sig_w = _softplus(rho_t)
    sig_b = _softplus(layer.bias_rho)
    w = mu_t + sig_w * eps_w
    b = layer.bias_mu + sig_b * eps_b
    y = x @ w + b
    lp = (jnp.sum(-LOG_SQRT_2PI - 0.5 * w * w)
          + jnp.sum(-LOG_SQRT_2PI - 0.5 * b * b))
    lvp = (jnp.sum(-LOG_SQRT_2PI - jnp.log(sig_w) - 0.5 * eps_w * eps_w)
           + jnp.sum(-LOG_SQRT_2PI - jnp.log(sig_b) - 0.5 * eps_b * eps_b))
    return y, lp, lvp


if __name__ == "__main__":
    key = jax.random.PRNGKey(0)
    k_param, k_x, k_eps = jax.random.split(key, 3)

    batch, in_features, out_features = 8, 32, 16
    layer = BayesianLinearPallas(in_features, out_features, k_param)
    x = jax.random.normal(k_x, (batch, in_features), jnp.float32)

    # --- eval path (weight = mu, bias = mu): check against plain-JAX linear ---
    layer.training = False
    y_eval = layer(x, k_eps, sample=False, calculate_log_probs=False)
    jax.block_until_ready(y_eval)
    y_ref = x @ layer.weight_mu.T + layer.bias_mu
    assert y_eval.shape == (batch, out_features)
    assert jnp.allclose(y_eval, y_ref, atol=1e-4, rtol=1e-4)

    # --- training path (reparameterized sample + log-prob side outputs) ---
    layer.training = True
    y_train = layer(x, k_eps, sample=True, calculate_log_probs=True)
    jax.block_until_ready(y_train)
    lp = layer.log_prior
    lvp = layer.log_variational_posterior
    jax.block_until_ready(lp)
    jax.block_until_ready(lvp)

    eps_w_p, eps_b_p = layer._draw_eps(k_eps)
    y_ref_t, lp_ref, lvp_ref = _reference_forward(layer, x, eps_w_p, eps_b_p)
    assert y_train.shape == (batch, out_features)
    assert jnp.allclose(y_train, y_ref_t, atol=1e-3, rtol=1e-3)
    assert jnp.allclose(lp, lp_ref, atol=1e-2, rtol=1e-4)
    assert jnp.allclose(lvp, lvp_ref, atol=1e-2, rtol=1e-4)
    assert bool(jnp.isfinite(lp)) and bool(jnp.isfinite(lvp))

    print("KERNEL_OK")
</pallas_src>

<mosaic_0001>
module attributes {stable_mosaic.version = 11 : i64} {
  func.func @_bayesian_linear_kernel(%arg0: i32, %arg1: i32, %arg2: memref<8x128xf32, #tpu.memory_space<vmem>>, %arg3: memref<128x128xf32, #tpu.memory_space<vmem>>, %arg4: memref<128x128xf32, #tpu.memory_space<vmem>>, %arg5: memref<128x128xf32, #tpu.memory_space<vmem>>, %arg6: memref<1x128xf32, #tpu.memory_space<vmem>>, %arg7: memref<1x128xf32, #tpu.memory_space<vmem>>, %arg8: memref<1x128xf32, #tpu.memory_space<vmem>>, %arg9: memref<8x128xf32, #tpu.memory_space<vmem>>, %arg10: memref<1x1x128xf32, #tpu.memory_space<vmem>>, %arg11: memref<1x1x128xf32, #tpu.memory_space<vmem>>, %arg12: memref<8x128xf32, #tpu.memory_space<vmem>>, %arg13: memref<128x128xf32, #tpu.memory_space<vmem>>, %arg14: memref<128x128xf32, #tpu.memory_space<vmem>>) attributes {dimension_semantics = [#tpu.dimension_semantics<parallel>, #tpu.dimension_semantics<arbitrary>], iteration_bounds = array<i64: 1, 1>, scalar_prefetch = 0 : i64, scratch_operands = 3 : i64, tpu.core_type = #tpu.core_type<tc>, window_params = [{transform_indices = @transform_0, window_bounds = array<i64: 8, 128>}, {transform_indices = @transform_1, window_bounds = array<i64: 128, 128>}, {transform_indices = @transform_2, window_bounds = array<i64: 128, 128>}, {transform_indices = @transform_3, window_bounds = array<i64: 128, 128>}, {transform_indices = @transform_4, window_bounds = array<i64: 1, 128>}, {transform_indices = @transform_5, window_bounds = array<i64: 1, 128>}, {transform_indices = @transform_6, window_bounds = array<i64: 1, 128>}, {transform_indices = @transform_7, window_bounds = array<i64: 8, 128>}, {transform_indices = @transform_8, window_bounds = array<i64: 1, 1, 128>}, {transform_indices = @transform_9, window_bounds = array<i64: 1, 1, 128>}]} {
    %c0_i32 = arith.constant 0 : i32
    %0 = arith.cmpi eq, %arg1, %c0_i32 : i32
    %1 = arith.extui %0 : i1 to i32
    %c0_i32_0 = arith.constant 0 : i32
    %2 = arith.cmpi ne, %1, %c0_i32_0 : i32
    scf.if %2 {
      %cst_31 = arith.constant 0.000000e+00 : f32
      %59 = vector.broadcast %cst_31 : f32 to vector<8x128xf32>
      %c0_32 = arith.constant 0 : index
      %c0_33 = arith.constant 0 : index
      %60 = vector.load %arg12[%c0_32, %c0_33] : memref<8x128xf32, #tpu.memory_space<vmem>>, vector<8x128xf32>
      tpu.vector_store %arg12[%c0_32, %c0_33], %59 {strides = array<i32>} : memref<8x128xf32, #tpu.memory_space<vmem>>, vector<8x128xf32>,
      %cst_34 = arith.constant 0.000000e+00 : f32
      %61 = vector.broadcast %cst_34 : f32 to vector<128x128xf32>
      %c0_35 = arith.constant 0 : index
      %c0_36 = arith.constant 0 : index
      %62 = vector.load %arg13[%c0_35, %c0_36] : memref<128x128xf32, #tpu.memory_space<vmem>>, vector<128x128xf32>
      tpu.vector_store %arg13[%c0_35, %c0_36], %61 {strides = array<i32>} : memref<128x128xf32, #tpu.memory_space<vmem>>, vector<128x128xf32>,
      %cst_37 = arith.constant 0.000000e+00 : f32
      %63 = vector.broadcast %cst_37 : f32 to vector<128x128xf32>
      %c0_38 = arith.constant 0 : index
      %c0_39 = arith.constant 0 : index
      %64 = vector.load %arg14[%c0_38, %c0_39] : memref<128x128xf32, #tpu.memory_space<vmem>>, vector<128x128xf32>
      tpu.vector_store %arg14[%c0_38, %c0_39], %63 {strides = array<i32>} : memref<128x128xf32, #tpu.memory_space<vmem>>, vector<128x128xf32>,
    } else {
    }
    %c0 = arith.constant 0 : index
    %c0_1 = arith.constant 0 : index
    %3 = vector.load %arg3[%c0, %c0_1] : memref<128x128xf32, #tpu.memory_space<vmem>>, vector<128x128xf32>
    %c0_2 = arith.constant 0 : index
    %c0_3 = arith.constant 0 : index
    %4 = vector.load %arg4[%c0_2, %c0_3] : memref<128x128xf32, #tpu.memory_space<vmem>>, vector<128x128xf32>
    %c0_4 = arith.constant 0 : index
    %c0_5 = arith.constant 0 : index
    %5 = vector.load %arg5[%c0_4, %c0_5] : memref<128x128xf32, #tpu.memory_space<vmem>>, vector<128x128xf32>
    %cst = arith.constant 0.000000e+00 : f32
    %6 = vector.broadcast %cst : f32 to vector<128x128xf32>
    %7 = arith.maximumf %4, %6 : vector<128x128xf32>
    %8 = math.absf %4 : vector<128x128xf32>
    %cst_6 = arith.constant 0.000000e+00 : f32
    %9 = vector.broadcast %cst_6 : f32 to vector<128x128xf32>
    %10 = arith.subf %9, %8 : vector<128x128xf32>
    %11 = math.exp %10 : vector<128x128xf32>
    %12 = math.log1p %11 : vector<128x128xf32>
    %13 = arith.addf %7, %12 : vector<128x128xf32>
    %14 = arith.mulf %13, %5 : vector<128x128xf32>
    %15 = arith.addf %3, %14 : vector<128x128xf32>
    %c0_7 = arith.constant 0 : index
    %c0_8 = arith.constant 0 : index
    %16 = vector.load %arg12[%c0_7, %c0_8] : memref<8x128xf32, #tpu.memory_space<vmem>>, vector<8x128xf32>
    %c0_9 = arith.constant 0 : index
    %c0_10 = arith.constant 0 : index
    %17 = vector.load %arg2[%c0_9, %c0_10] : memref<8x128xf32, #tpu.memory_space<vmem>>, vector<8x128xf32>
    %cst_11 = arith.constant dense<0.000000e+00> : vector<8x128xf32>
    %18 = tpu.matmul %17, %15, %cst_11 {dimension_numbers = #tpu.dot_dimension_numbers<[1], [0], [0], [1], [0, 0, 1, 1], [], []>} : vector<8x128xf32>, vector<128x128xf32>, vector<8x128xf32> -> vector<8x128xf32>
    %19 = arith.addf %16, %18 : vector<8x128xf32>
    %c0_12 = arith.constant 0 : index
    %c0_13 = arith.constant 0 : index
    %20 = vector.load %arg12[%c0_12, %c0_13] : memref<8x128xf32, #tpu.memory_space<vmem>>, vector<8x128xf32>
    tpu.vector_store %arg12[%c0_12, %c0_13], %19 {strides = array<i32>} : memref<8x128xf32, #tpu.memory_space<vmem>>, vector<8x128xf32>,
    %21 = arith.mulf %15, %15 : vector<128x128xf32>
    %cst_14 = arith.constant 5.000000e-01 : f32
    %22 = vector.broadcast %cst_14 : f32 to vector<128x128xf32>
    %23 = arith.mulf %22, %21 : vector<128x128xf32>
    %cst_15 = arith.constant -0.918938517 : f32
    %24 = vector.broadcast %cst_15 : f32 to vector<128x128xf32>
    %25 = arith.subf %24, %23 : vector<128x128xf32>
    %26 = math.log %13 : vector<128x128xf32>
    %cst_16 = arith.constant -0.918938517 : f32
    %27 = vector.broadcast %cst_16 : f32 to vector<128x128xf32>
    %28 = arith.subf %27, %26 : vector<128x128xf32>
    %29 = arith.mulf %5, %5 : vector<128x128xf32>
    %cst_17 = arith.constant 5.000000e-01 : f32
    %30 = vector.broadcast %cst_17 : f32 to vector<128x128xf32>
    %31 = arith.mulf %30, %29 : vector<128x128xf32>
    %32 = arith.subf %28, %31 : vector<128x128xf32>
    %33 = tpu.iota {dimensions = array<i32: 0>} : vector<128x128xi32>
    %c128_i32 = arith.constant 128 : i32
    %34 = arith.muli %arg1, %c128_i32 : i32
    %35 = vector.broadcast %34 : i32 to vector<128x128xi32>
    %36 = arith.addi %33, %35 : vector<128x128xi32>
    %c32_i32 = arith.constant 32 : i32
    %37 = vector.broadcast %c32_i32 : i32 to vector<128x128xi32>
    %38 = arith.cmpi slt, %36, %37 : vector<128x128xi32>
    %39 = tpu.iota {dimensions = array<i32: 1>} : vector<128x128xi32>
    %c128_i32_18 = arith.constant 128 : i32
    %40 = arith.muli %arg0, %c128_i32_18 : i32
    %41 = vector.broadcast %40 : i32 to vector<128x128xi32>
    %42 = arith.addi %39, %41 : vector<128x128xi32>
    %c16_i32 = arith.constant 16 : i32
    %43 = vector.broadcast %c16_i32 : i32 to vector<128x128xi32>
    %44 = arith.cmpi slt, %42, %43 : vector<128x128xi32>
    %45 = arith.andi %38, %44 : vector<128x128xi1>
    %cst_19 = arith.constant 0.000000e+00 : f32
    %46 = vector.broadcast %cst_19 : f32 to vector<128x128xf32>
    %47 = arith.select %45, %25, %46 : vector<128x128xi1>, vector<128x128xf32>
    %cst_20 = arith.constant 0.000000e+00 : f32
    %48 = vector.broadcast %cst_20 : f32 to vector<128x128xf32>
    %49 = arith.select %45, %32, %48 : vector<128x128xi1>, vector<128x128xf32>
    %c0_21 = arith.constant 0 : index
    %c0_22 = arith.constant 0 : index
    %50 = vector.load %arg13[%c0_21, %c0_22] : memref<128x128xf32, #tpu.memory_space<vmem>>, vector<128x128xf32>
    %51 = arith.addf %50, %47 : vector<128x128xf32>
    %c0_23 = arith.constant 0 : index
    %c0_24 = arith.constant 0 : index
    %52 = vector.load %arg13[%c0_23, %c0_24] : memref<128x128xf32, #tpu.memory_space<vmem>>, vector<128x128xf32>
    tpu.vector_store %arg13[%c0_23, %c0_24], %51 {strides = array<i32>} : memref<128x128xf32, #tpu.memory_space<vmem>>, vector<128x128xf32>,
    %c0_25 = arith.constant 0 : index
    %c0_26 = arith.constant 0 : index
    %53 = vector.load %arg14[%c0_25, %c0_26] : memref<128x128xf32, #tpu.memory_space<vmem>>, vector<128x128xf32>
    %54 = arith.addf %53, %49 : vector<128x128xf32>
    %c0_27 = arith.constant 0 : index
    %c0_28 = arith.constant 0 : index
    %55 = vector.load %arg14[%c0_27, %c0_28] : memref<128x128xf32, #tpu.memory_space<vmem>>, vector<128x128xf32>
    tpu.vector_store %arg14[%c0_27, %c0_28], %54 {strides = array<i32>} : memref<128x128xf32, #tpu.memory_space<vmem>>, vector<128x128xf32>,
    %c0_i32_29 = arith.constant 0 : i32
    %56 = arith.cmpi eq, %arg1, %c0_i32_29 : i32
    %57 = arith.extui %56 : i1 to i32
    %c0_i32_30 = arith.constant 0 : i32
    %58 = arith.cmpi ne, %57, %c0_i32_30 : i32
    scf.if %58 {
      %c0_31 = arith.constant 0 : index
      %c0_32 = arith.constant 0 : index
      %59 = vector.load %arg6[%c0_31, %c0_32] : memref<1x128xf32, #tpu.memory_space<vmem>>, vector<1x128xf32>
      %c0_33 = arith.constant 0 : index
      %c0_34 = arith.constant 0 : index
      %60 = vector.load %arg7[%c0_33, %c0_34] : memref<1x128xf32, #tpu.memory_space<vmem>>, vector<1x128xf32>
      %c0_35 = arith.constant 0 : index
      %c0_36 = arith.constant 0 : index
      %61 = vector.load %arg8[%c0_35, %c0_36] : memref<1x128xf32, #tpu.memory_space<vmem>>, vector<1x128xf32>
      %cst_37 = arith.constant 0.000000e+00 : f32
      %62 = vector.broadcast %cst_37 : f32 to vector<1x128xf32>
      %63 = arith.maximumf %60, %62 : vector<1x128xf32>
      %64 = math.absf %60 : vector<1x128xf32>
      %cst_38 = arith.constant 0.000000e+00 : f32
      %65 = vector.broadcast %cst_38 : f32 to vector<1x128xf32>
      %66 = arith.subf %65, %64 : vector<1x128xf32>
      %67 = math.exp %66 : vector<1x128xf32>
      %68 = math.log1p %67 : vector<1x128xf32>
      %69 = arith.addf %63, %68 : vector<1x128xf32>
      %70 = arith.mulf %69, %61 : vector<1x128xf32>
      %71 = arith.addf %59, %70 : vector<1x128xf32>
      %c0_39 = arith.constant 0 : index
      %c0_40 = arith.constant 0 : index
      %72 = vector.load %arg12[%c0_39, %c0_40] : memref<8x128xf32, #tpu.memory_space<vmem>>, vector<8x128xf32>
      %73 = vector.broadcast %71 : vector<1x128xf32> to vector<8x128xf32>
      %74 = arith.addf %72, %73 : vector<8x128xf32>
      %c0_41 = arith.constant 0 : index
      %c0_42 = arith.constant 0 : index
      %75 = vector.load %arg9[%c0_41, %c0_42] : memref<8x128xf32, #tpu.memory_space<vmem>>, vector<8x128xf32>
      tpu.vector_store %arg9[%c0_41, %c0_42], %74 {strides = array<i32>} : memref<8x128xf32, #tpu.memory_space<vmem>>, vector<8x128xf32>,
      %76 = arith.mulf %71, %71 : vector<1x128xf32>
      %cst_43 = arith.constant 5.000000e-01 : f32
      %77 = vector.broadcast %cst_43 : f32 to vector<1x128xf32>
      %78 = arith.mulf %77, %76 : vector<1x128xf32>
      %cst_44 = arith.constant -0.918938517 : f32
      %79 = vector.broadcast %cst_44 : f32 to vector<1x128xf32>
      %80 = arith.subf %79, %78 : vector<1x128xf32>
      %81 = math.log %69 : vector<1x128xf32>
      %cst_45 = arith.constant -0.918938517 : f32
      %82 = vector.broadcast %cst_45 : f32 to vector<1x128xf32>
      %83 = arith.subf %82, %81 : vector<1x128xf32>
      %84 = arith.mulf %61, %61 : vector<1x128xf32>
      %cst_46 = arith.constant 5.000000e-01 : f32
      %85 = vector.broadcast %cst_46 : f32 to vector<1x128xf32>
      %86 = arith.mulf %85, %84 : vector<1x128xf32>
      %87 = arith.subf %83, %86 : vector<1x128xf32>
      %88 = tpu.iota {dimensions = array<i32: 1>} : vector<1x128xi32>
      %c128_i32_47 = arith.constant 128 : i32
      %89 = arith.muli %arg0, %c128_i32_47 : i32
      %90 = vector.broadcast %89 : i32 to vector<1x128xi32>
      %91 = arith.addi %88, %90 : vector<1x128xi32>
      %c16_i32_48 = arith.constant 16 : i32
      %92 = vector.broadcast %c16_i32_48 : i32 to vector<1x128xi32>
      %93 = arith.cmpi slt, %91, %92 : vector<1x128xi32>
      %cst_49 = arith.constant 0.000000e+00 : f32
      %94 = vector.broadcast %cst_49 : f32 to vector<1x128xf32>
      %95 = arith.select %93, %80, %94 : vector<1x128xi1>, vector<1x128xf32>
      %cst_50 = arith.constant 0.000000e+00 : f32
      %96 = vector.broadcast %cst_50 : f32 to vector<1x128xf32>
      %97 = arith.select %93, %87, %96 : vector<1x128xi1>, vector<1x128xf32>
      %c0_51 = arith.constant 0 : index
      %c0_52 = arith.constant 0 : index
      %98 = vector.load %arg13[%c0_51, %c0_52] : memref<128x128xf32, #tpu.memory_space<vmem>>, vector<128x128xf32>
      %cst_53 = arith.constant dense<0.000000e+00> : vector<128xf32>
      %99 = vector.multi_reduction <add>, %98, %cst_53 [0] : vector<128x128xf32> to vector<128xf32>
      %100 = vector.shape_cast %99 : vector<128xf32> to vector<1x128xf32>
      %101 = arith.addf %100, %95 : vector<1x128xf32>
      %c0_54 = arith.constant 0 : index
      %c0_55 = arith.constant 0 : index
      %102 = vector.load %arg14[%c0_54, %c0_55] : memref<128x128xf32, #tpu.memory_space<vmem>>, vector<128x128xf32>
      %cst_56 = arith.constant dense<0.000000e+00> : vector<128xf32>
      %103 = vector.multi_reduction <add>, %102, %cst_56 [0] : vector<128x128xf32> to vector<128xf32>
      %104 = vector.shape_cast %103 : vector<128xf32> to vector<1x128xf32>
      %105 = arith.addf %104, %97 : vector<1x128xf32>
      %106 = vector.shape_cast %101 : vector<1x128xf32> to vector<1x1x128xf32>
      %c0_57 = arith.constant 0 : index
      %c0_58 = arith.constant 0 : index
      %c0_59 = arith.constant 0 : index
      %107 = vector.load %arg10[%c0_57, %c0_58, %c0_59] : memref<1x1x128xf32, #tpu.memory_space<vmem>>, vector<1x1x128xf32>
      tpu.vector_store %arg10[%c0_57, %c0_58, %c0_59], %106 {strides = array<i32>} : memref<1x1x128xf32, #tpu.memory_space<vmem>>, vector<1x1x128xf32>,
      %108 = vector.shape_cast %105 : vector<1x128xf32> to vector<1x1x128xf32>
      %c0_60 = arith.constant 0 : index
      %c0_61 = arith.constant 0 : index
      %c0_62 = arith.constant 0 : index
      %109 = vector.load %arg11[%c0_60, %c0_61, %c0_62] : memref<1x1x128xf32, #tpu.memory_space<vmem>>, vector<1x1x128xf32>
      tpu.vector_store %arg11[%c0_60, %c0_61, %c0_62], %108 {strides = array<i32>} : memref<1x1x128xf32, #tpu.memory_space<vmem>>, vector<1x1x128xf32>,
    } else {
    }
    return
  }
  func.func @transform_0(%arg0: i32, %arg1: i32) -> (i32, i32) {
    %c0_i32 = arith.constant 0 : i32
    %c0_i32_0 = arith.constant 0 : i32
    return %c0_i32, %arg1 : i32, i32
  }
  func.func @transform_1(%arg0: i32, %arg1: i32) -> (i32, i32) {
    %c0_i32 = arith.constant 0 : i32
    return %arg1, %arg0 : i32, i32
  }
  func.func @transform_2(%arg0: i32, %arg1: i32) -> (i32, i32) {
    %c0_i32 = arith.constant 0 : i32
    return %arg1, %arg0 : i32, i32
  }
  func.func @transform_3(%arg0: i32, %arg1: i32) -> (i32, i32) {
    %c0_i32 = arith.constant 0 : i32
    return %arg1, %arg0 : i32, i32
  }
  func.func @transform_4(%arg0: i32, %arg1: i32) -> (i32, i32) {
    %c0_i32 = arith.constant 0 : i32
    %c0_i32_0 = arith.constant 0 : i32
    return %c0_i32, %arg0 : i32, i32
  }
  func.func @transform_5(%arg0: i32, %arg1: i32) -> (i32, i32) {
    %c0_i32 = arith.constant 0 : i32
    %c0_i32_0 = arith.constant 0 : i32
    return %c0_i32, %arg0 : i32, i32
  }
  func.func @transform_6(%arg0: i32, %arg1: i32) -> (i32, i32) {
    %c0_i32 = arith.constant 0 : i32
    %c0_i32_0 = arith.constant 0 : i32
    return %c0_i32, %arg0 : i32, i32
  }
  func.func @transform_7(%arg0: i32, %arg1: i32) -> (i32, i32) {
    %c0_i32 = arith.constant 0 : i32
    %c0_i32_0 = arith.constant 0 : i32
    return %c0_i32, %arg0 : i32, i32
  }
  func.func @transform_8(%arg0: i32, %arg1: i32) -> (i32, i32, i32) {
    %c0_i32 = arith.constant 0 : i32
    %c0_i32_0 = arith.constant 0 : i32
    %c0_i32_1 = arith.constant 0 : i32
    return %arg0, %c0_i32, %c0_i32_0 : i32, i32, i32
  }
  func.func @transform_9(%arg0: i32, %arg1: i32) -> (i32, i32, i32) {
    %c0_i32 = arith.constant 0 : i32
    %c0_i32_0 = arith.constant 0 : i32
    %c0_i32_1 = arith.constant 0 : i32
    return %arg0, %c0_i32, %c0_i32_0 : i32, i32, i32
  }
}

</mosaic_0001>

<bundles_post_ra>
// kernel: tpu_custom_call.1
= control target key start
LH: loop header
LB: loop body
LE: loop exit
PB: predicated region body
PF: predicated region fallthrough
CT: control target
= control target key end

     0   :  { %15 = vsyncpa [#allocation6], 0  ;;  %s1544_s0 = inlined_call_operand.hbm [shape: f32[8,128], index: 0, kind: input, shape index: {}]   ;;  %s1545_s1 = inlined_call_operand.hbm [shape: f32[128,128], index: 1, kind: input, shape index: {}]   ;;  %s1546_s2 = inlined_call_operand.hbm [shape: f32[128,128], index: 2, kind: input, shape index: {}]   ;;  %s1547_s3 = inlined_call_operand.hbm [shape: f32[128,128], index: 3, kind: input, shape index: {}]   ;;  %s1548_s4 = inlined_call_operand.vmem [shape: f32[1,128], index: 4, kind: input, shape index: {}]   ;;  %s1549_s5 = inlined_call_operand.vmem [shape: f32[1,128], index: 5, kind: input, shape index: {}]   ;;  %s1550_s6 = inlined_call_operand.vmem [shape: f32[1,128], index: 6, kind: input, shape index: {}]   ;;  %s1551_s7 = inlined_call_operand.hbm [shape: f32[8,128], index: 7, kind: output, shape index: {0}]   ;;  %s1552_s8 = inlined_call_operand.hbm [shape: f32[1,1,128], index: 8, kind: output, shape index: {1}]   ;;  %s1553_s9 = inlined_call_operand.hbm [shape: f32[1,1,128], index: 9, kind: output, shape index: {2}]  }
   0x1   :  { %16 = vsyncpa [#allocation9], 0 }
   0x2   :  { %17 = vsyncpa [#allocation12], 0 }
   0x3   :  { %18 = vsyncpa [#allocation7], 0  ;;  %s35_s11 = sshll.u32 %s1545_s1, 4  ;;  %s36_s11 = int_to_ptr.hbm [resolvable:$true] %s35_s11 }
   0x4   :  { %19 = vsyncpa [#allocation15], 0  ;;  %s1251_s12 = smov [#allocation8]   ;;  %s25_s16 = sshll.u32 %s1544_s0, 4  ;;  %s26_s16 = int_to_ptr.hbm [resolvable:$true] %s25_s16 }
   0x5   :  { %s37_s13 = sshll.u32 %s1251_s12, 4  ;;  %s1252_s17 = smov 128   ;;  %s38_s13 = int_to_ptr.vmem [resolvable:$true] %s37_s13 }
   0x6   :  { %s1253_s18 = smov 8   ;;  %s1254_s19 = smov [#allocation5]  }
   0x7   :  { %43 = dma.hbm_to_vmem [thread:$0]  %s36_s11, 2048, %s38_s13, [#allocation9], %s1252_s17, %s1252_s17, %s1253_s18  }
   0x8   :  { %s27_s20 = sshll.u32 %s1254_s19, 4  ;;  %s48_s23 = sshll.u32 %s1546_s2, 4  ;;  %s28_s20 = int_to_ptr.vmem [resolvable:$true] %s27_s20  ;;  %s49_s23 = int_to_ptr.hbm [resolvable:$true] %s48_s23 }
   0x9   :  { %30 = dma.hbm_to_vmem [thread:$0]  %s26_s16, 128, %s28_s20, [#allocation6]  }
   0xa   :  { %s61_s25 = sshll.u32 %s1547_s3, 4  ;;  %s1255_s26 = smov [#allocation10]   ;;  %s62_s25 = int_to_ptr.hbm [resolvable:$true] %s61_s25 }
   0xb   :  { %s50_s27 = sshll.u32 %s1255_s26, 4  ;;  %s1256_s0 = smov [#allocation11]   ;;  %s51_s27 = int_to_ptr.vmem [resolvable:$true] %s50_s27 }
   0xc   :  { %56 = dma.hbm_to_vmem [thread:$0]  %s49_s23, 2048, %s51_s27, [#allocation9], %s1252_s17, %s1252_s17, %s1253_s18  }
   0xd   :  { %s63_s28 = sshll.u32 %s1256_s0, 4  ;;  %s64_s28 = int_to_ptr.vmem [resolvable:$true] %s63_s28 }
   0xe   :  { %69 = dma.hbm_to_vmem [thread:$0]  %s62_s25, 2048, %s64_s28, [#allocation12], %s1252_s17, %s1252_s17, %s1253_s18  }
   0xf   :  { %1241 = dma.done.wait [#allocation6], 128  }
  0x10   :  { %1242 = vsyncadd [#allocation6], 4294967168 }
  0x11   :  { %1243 = dma.done.wait [#allocation9], 4096  }
  0x12   :  { %1244 = vsyncadd [#allocation9], 4294963200 }
  0x13   :  { %1245 = dma.done.wait [#allocation12], 2048  }
  0x14   :  { %1246 = vsyncadd [#allocation12], 4294965248  ;;  %v1322_v0 = vld [vmem:[#allocation10 + $0x78] sm:$0xff]  ;;  %v1325_v2 = vld [vmem:[#allocation10 + $0x70] sm:$0xff]  ;;  %s954_s13 = sshll.u32 %s1552_s8, 4  ;;  %s1258_s14 = smov [#allocation16]   ;;  %s955_s13 = int_to_ptr.hbm [resolvable:$true] %s954_s13 }
  0x15   :  { %v208_v1 = vand.u32 2147483647, %v1322_v0  ;;  %v207_v3 = vand.u32 2147483647, %v1325_v2  ;;  %v1328_v4 = vld [vmem:[#allocation10 + $0x68] sm:$0xff]  ;;  %v1331_v7 = vld [vmem:[#allocation10 + $0x60] sm:$0xff] }
  0x16   :  { %v206_v6 = vand.u32 2147483647, %v1328_v4  ;;  %v205_v9 = vand.u32 2147483647, %v1331_v7  ;;  %v1334_v10 = vld [vmem:[#allocation10 + $0x58] sm:$0xff]  ;;  %v1337_v16 = vld [vmem:[#allocation10 + $0x50] sm:$0xff] }
  0x17   :  { %v224_v5 = vsub.f32 0.0, %v208_v1  ;;  %v223_v8 = vsub.f32 0.0, %v207_v3  ;;  %v204_v15 = vand.u32 2147483647, %v1334_v10  ;;  %v1339_v18 = vld [vmem:[#allocation10 + $0x48] sm:$0xff]  ;;  %v192_v22 = vmax.f32 %v1322_v0, 0.0 }
  0x18   :  { %v222_v12 = vsub.f32 0.0, %v206_v6  ;;  %v221_v14 = vsub.f32 0.0, %v205_v9  ;;  %v203_v21 = vand.u32 2147483647, %v1337_v16  ;;  %v191_v23 = vmax.f32 %v1325_v2, 0.0  ;;  %v1345_v25 = vld [vmem:[#allocation10 + $0x40] sm:$0xff] }
  0x19   :  { %v255_v11 = vmul.f32 1.442695, %v224_v5  ;;  %v253_v13 = vmul.f32 1.442695, %v223_v8  ;;  %v220_v20 = vsub.f32 0.0, %v204_v15  ;;  %v190_v26 = vmax.f32 %v1328_v4, 0.0 }
  0x1a   :  { %v251_v17 = vmul.f32 1.442695, %v222_v12  ;;  %v249_v19 = vmul.f32 1.442695, %v221_v14  ;;  %v202_v24 = vand.u32 2147483647, %v1339_v18 }
  0x1b   :  { %995 = vpow2.f32 %v255_v11  ;;  %v247_v27 = vmul.f32 1.442695, %v220_v20  ;;  %v219_v28 = vsub.f32 0.0, %v203_v21  ;;  %v1348_v29 = vld [vmem:[#allocation10 + $0x38] sm:$0xff]  ;;  %v1350_v30 = vld [vmem:[#allocation10 + $0x30] sm:$0xff]  ;;  %v189_v31 = vmax.f32 %v1331_v7, 0.0 }
  0x1c   :  { %997 = vpow2.f32 %v253_v13  ;;  %v218_v32 = vsub.f32 0.0, %v202_v24  ;;  %v201_v33 = vand.u32 2147483647, %v1345_v25  ;;  %v200_v34 = vand.u32 2147483647, %v1348_v29  ;;  %v1362_v43 = vld [vmem:[#allocation10 + $0x28] sm:$0xff] }
  0x1d   :  { %999 = vpow2.f32 %v251_v17  ;;  %v188_v35 = vmax.f32 %v1334_v10, 0.0  ;;  %v245_v36 = vmul.f32 1.442695, %v219_v28  ;;  %v199_v37 = vand.u32 2147483647, %v1350_v30  ;;  %s963_s15 = sshll.u32 %s1258_s14, 4  ;;  %s964_s15 = int_to_ptr.vmem [resolvable:$true] %s963_s15 }
  0x1e   :  { %1001 = vpow2.f32 %v249_v19  ;;  %v187_v39 = vmax.f32 %v1337_v16, 0.0  ;;  %v243_v40 = vmul.f32 1.442695, %v218_v32  ;;  %v1358_v41 = vsub.f32 0.0, %v201_v33  ;;  %s965_s18 = sshll.u32 %s1553_s9, 4  ;;  %s1259_s8 = smov [#allocation13]   ;;  %s966_s18 = int_to_ptr.hbm [resolvable:$true] %s965_s18 }
  0x1f   :  { %1003 = vpow2.f32 %v247_v27  ;;  %v1360_v42 = vsub.f32 0.0, %v200_v34  ;;  %v198_v55 = vand.u32 2147483647, %v1362_v43  ;;  %v169_v34 = vld [vmem:[#allocation11 + $0x40] sm:$0xff]  ;;  %s941_s9 = sshll.u32 %s1259_s8, 4  ;;  %s943_s21 = sshll.u32 %s1551_s7, 4  ;;  %s942_s9 = int_to_ptr.vmem [resolvable:$true] %s941_s9  ;;  %s944_s21 = int_to_ptr.hbm [resolvable:$true] %s943_s21 }
  0x20   :  { %1005 = vpow2.f32 %v245_v36 }
  0x21   :  { %v996_v38 = vpop.eup %995  ;;  %1007 = vpow2.f32 %v243_v40 }
  0x22   :  { %v998_v44 = vpop.eup %997  ;;  %v392_v45 = vadd.f32 1.0, %v996_v38  ;;  %v395_v46 = vmul.f32 -0.5, %v996_v38  ;;  %v398_v47 = vand.u32 2147483647, %v996_v38 }
  0x23   :  { %v1000_v48 = vpop.eup %999  ;;  %v383_v49 = vadd.f32 1.0, %v998_v44  ;;  %v386_v50 = vmul.f32 -0.5, %v998_v44  ;;  %v389_v51 = vand.u32 2147483647, %v998_v44 }
  0x24   :  { %v1002_v52 = vpop.eup %1001  ;;  %1009 = vlog2.f32 %v392_v45  ;;  %v396_v53 = vadd.f32 1.0, %v395_v46  ;;  %v374_v54 = vadd.f32 1.0, %v1000_v48  ;;  %vm1365_vm0 = vcmp.lt.f32.partialorder %v398_v47, 0.0004427343  ;;  %v176_v45 = vld [vmem:[#allocation11 + $0x78] sm:$0xff] }
  0x25   :  { %1011 = vlog2.f32 %v383_v49  ;;  %v387_v57 = vadd.f32 1.0, %v386_v50  ;;  %v377_v58 = vmul.f32 -0.5, %v1000_v48  ;;  %v1004_v59 = vpop.eup %1003  ;;  %vm1369_vm1 = vcmp.lt.f32.partialorder %v389_v51, 0.0004427343 }
  0x26   :  { %1013 = vlog2.f32 %v374_v54  ;;  %v380_v61 = vand.u32 2147483647, %v1000_v48  ;;  %v365_v62 = vadd.f32 1.0, %v1002_v52  ;;  %v397_v63 = vmul.f32 %v996_v38, %v396_v53  ;;  %v1006_v6 = vpop.eup %1005 }
  0x27   :  { %v378_v1 = vadd.f32 1.0, %v377_v58  ;;  %v368_v3 = vmul.f32 -0.5, %v1002_v52  ;;  %v371_v5 = vand.u32 2147483647, %v1002_v52  ;;  %v388_v8 = vmul.f32 %v998_v44, %v387_v57  ;;  %v1373_v12 = vpop.eup %1007  ;;  %v144_v58 = vld [vmem:[#allocation8 + $0x78] sm:$0xff] }
  0x28   :  { %1015 = vlog2.f32 %v365_v62  ;;  %v356_v9 = vadd.f32 1.0, %v1004_v59  ;;  %v359_v11 = vmul.f32 -0.5, %v1004_v59  ;;  %vm1375_vm2 = vcmp.lt.f32.partialorder %v380_v61, 0.0004427343  ;;  %v174_v61 = vld [vmem:[#allocation11 + $0x68] sm:$0xff] }
  0x29   :  { %v379_v13 = vmul.f32 %v1000_v48, %v378_v1  ;;  %v369_v15 = vadd.f32 1.0, %v368_v3  ;;  %v362_v17 = vand.u32 2147483647, %v1004_v59  ;;  %v347_v21 = vadd.f32 1.0, %v1006_v6 }
  0x2a   :  { %v1010_v19 = vpop.eup %1009  ;;  %1017 = vlog2.f32 %v356_v9  ;;  %v360_v20 = vadd.f32 1.0, %v359_v11  ;;  %v350_v24 = vmul.f32 -0.5, %v1006_v6  ;;  %vm1379_vm3 = vcmp.lt.f32.partialorder %v371_v5, 0.0004427343 }
  0x2b   :  { %v1012_v27 = vpop.eup %1011  ;;  %v394_v28 = vmul.f32 0.6931472, %v1010_v19  ;;  %v370_v32 = vmul.f32 %v1002_v52, %v369_v15  ;;  %vm1383_vm4 = vcmp.lt.f32.partialorder %v362_v17, 0.0004427343  ;;  %1019 = vlog2.f32 %v347_v21  ;;  %v175_v52 = vld [vmem:[#allocation11 + $0x70] sm:$0xff]  ;;  %v141_v17 = vld [vmem:[#allocation8 + $0x60] sm:$0xff] }
  0x2c   :  { %v1014_v36 = vpop.eup %1013  ;;  %v385_v38 = vmul.f32 0.6931472, %v1012_v27  ;;  %v351_v40 = vadd.f32 1.0, %v350_v24  ;;  %v353_v44 = vand.u32 2147483647, %v1006_v6  ;;  %v361_v48 = vmul.f32 %v1004_v59, %v360_v20  ;;  %v172_v19 = vld [vmem:[#allocation11 + $0x58] sm:$0xff] }
  0x2d   :  { %v400_v46 = vsel %vm1365_vm0, %v397_v63, %v394_v28  ;;  %v376_v47 = vmul.f32 0.6931472, %v1014_v36  ;;  %v338_v49 = vadd.f32 1.0, %v1373_v12  ;;  %v341_v57 = vmul.f32 -0.5, %v1373_v12  ;;  %v140_v28 = vld [vmem:[#allocation8 + $0x58] sm:$0xff] }
  0x2e   :  { %v1016_v50 = vpop.eup %1015  ;;  %v416_v51 = vadd.f32 %v400_v46, %v192_v22  ;;  %v391_v53 = vsel %vm1369_vm1, %v388_v8, %v385_v38  ;;  %v352_v54 = vmul.f32 %v1006_v6, %v351_v40  ;;  %v143_v22 = vld [vmem:[#allocation8 + $0x70] sm:$0xff]  ;;  %v344_v3 = vand.u32 2147483647, %v1373_v12  ;;  %v142_v6 = vld [vmem:[#allocation8 + $0x68] sm:$0xff]  ;;  %v173_v8 = vld [vmem:[#allocation11 + $0x60] sm:$0xff] }
  0x2f   :  { %v415_v56 = vadd.f32 %v391_v53, %v191_v23  ;;  %v382_v59 = vsel %vm1375_vm2, %v379_v13, %v376_v47  ;;  %v367_v62 = vmul.f32 0.6931472, %v1016_v50  ;;  %1021 = vlog2.f32 %v338_v49  ;;  %v1432_v47 = vld [vmem:[#allocation10 + $0x18] sm:$0xff]  ;;  %v170_v49 = vld [vmem:[#allocation11 + $0x48] sm:$0xff] }
  0x30   :  { %v1018_v63 = vpop.eup %1017  ;;  %v432_v0 = vmul.f32 %v416_v51, %v176_v45  ;;  %v414_v60 = vadd.f32 %v382_v59, %v190_v26  ;;  %v342_v1 = vadd.f32 1.0, %v341_v57  ;;  %v241_v9 = vmul.f32 1.442695, %v1358_v41  ;;  %v139_v45 = vld [vmem:[#allocation8 + $0x50] sm:$0xff] }
  0x31   :  { %v431_v5 = vmul.f32 %v415_v56, %v175_v52  ;;  %v373_v2 = vsel %vm1379_vm3, %v370_v32, %v367_v62  ;;  %v358_v23 = vmul.f32 0.6931472, %v1018_v63  ;;  %v1020_v11 = vpop.eup %1019  ;;  %vm1407_vm5 = vcmp.lt.f32.partialorder %v353_v44, 0.0004427343  ;;  %v171_v32 = vld [vmem:[#allocation11 + $0x50] sm:$0xff]  ;;  %v1426_v44 = vld [vmem:[#allocation10 + $0x20] sm:$0xff] }
  0x32   :  { %v448_v13 = vadd.f32 %v432_v0, %v144_v58  ;;  %v430_v14 = vmul.f32 %v414_v60, %v174_v61  ;;  %v413_v15 = vadd.f32 %v373_v2, %v189_v31  ;;  %v349_v21 = vmul.f32 0.6931472, %v1020_v11  ;;  %v1437_v52 = vld [vmem:[#allocation10 + $0x10] sm:$0xff]  ;;  %v1443_v11 = vld [vmem:[#allocation10 + $0x8] sm:$0xff] }
  0x33   :  { %v447_v26 = vadd.f32 %v431_v5, %v143_v22  ;;  %v364_v20 = vsel %vm1383_vm4, %v361_v48, %v358_v23  ;;  %v343_v24 = vmul.f32 %v1373_v12, %v342_v1  ;;  %1023 = vpow2.f32 %v241_v9 }
  0x34   :  { %451 = vmatpush.msra.mxu0 %v448_v13  ;;  %v446_v41 = vadd.f32 %v430_v14, %v142_v6  ;;  %v429_v27 = vmul.f32 %v413_v15, %v173_v8  ;;  %v412_v7 = vadd.f32 %v364_v20, %v188_v35  ;;  %v355_v33 = vsel %vm1407_vm5, %v352_v54, %v349_v21  ;;  %v138_v54 = vld [vmem:[#allocation8 + $0x48] sm:$0xff] }
  0x35   :  { %v1022_v31 = vpop.eup %1021  ;;  %v186_v36 = vmax.f32 %v1339_v18, 0.0  ;;  %vm1419_vm6 = vcmp.lt.f32.partialorder %v344_v3, 0.0004427343  ;;  %v239_v12 = vmul.f32 1.442695, %v1360_v42  ;;  %v411_v10 = vadd.f32 %v355_v33, %v187_v39 }
  0x36   :  { %452 = vmatpush.msra.mxu0 %v447_v26  ;;  %v445_v38 = vadd.f32 %v429_v27, %v141_v17  ;;  %v428_v40 = vmul.f32 %v412_v7, %v172_v19  ;;  %v340_v35 = vmul.f32 0.6931472, %v1022_v31  ;;  %v215_v18 = vsub.f32 0.0, %v199_v37 }
  0x37   :  { %1025 = vpow2.f32 %v239_v12  ;;  %v214_v46 = vsub.f32 0.0, %v198_v55  ;;  %v427_v48 = vmul.f32 %v411_v10, %v171_v32  ;;  %v197_v51 = vand.u32 2147483647, %v1426_v44 }
  0x38   :  { %453 = vmatpush.msra.mxu0 %v446_v41  ;;  %v444_v42 = vadd.f32 %v428_v40, %v140_v28  ;;  %v346_v16 = vsel %vm1419_vm6, %v343_v24, %v340_v35  ;;  %v237_v50 = vmul.f32 1.442695, %v215_v18  ;;  %v196_v57 = vand.u32 2147483647, %v1432_v47 }
  0x39   :  { %v410_v39 = vadd.f32 %v346_v16, %v186_v36  ;;  %v1024_v53 = vpop.eup %1023  ;;  %v443_v37 = vadd.f32 %v427_v48, %v139_v45  ;;  %v235_v55 = vmul.f32 1.442695, %v214_v46  ;;  %v213_v59 = vsub.f32 0.0, %v197_v51  ;;  %v137_v48 = vld [vmem:[#allocation8 + $0x40] sm:$0xff] }
  0x3a   :  { %454 = vmatpush.msra.mxu0 %v445_v38  ;;  %v329_v56 = vadd.f32 1.0, %v1024_v53  ;;  %v332_v61 = vmul.f32 -0.5, %v1024_v53  ;;  %1027 = vpow2.f32 %v237_v50  ;;  %v212_v62 = vsub.f32 0.0, %v196_v57 }
  0x3b   :  { %v426_v58 = vmul.f32 %v410_v39, %v170_v49  ;;  %v195_v63 = vand.u32 2147483647, %v1437_v52  ;;  %v335_v60 = vand.u32 2147483647, %v1024_v53  ;;  %v233_v6 = vmul.f32 1.442695, %v213_v59 }
  0x3c   :  { %455 = vmatpush.msra.mxu0 %v444_v42  ;;  %1029 = vlog2.f32 %v329_v56  ;;  %v333_v1 = vadd.f32 1.0, %v332_v61  ;;  %v231_v8 = vmul.f32 1.442695, %v212_v62  ;;  %v185_v23 = vmax.f32 %v1345_v25, 0.0 }
  0x3d   :  { %v1026_v0 = vpop.eup %1025  ;;  %v442_v22 = vadd.f32 %v426_v58, %v138_v54  ;;  %1031 = vpow2.f32 %v235_v55  ;;  %v211_v2 = vsub.f32 0.0, %v195_v63  ;;  %v184_v9 = vmax.f32 %v1348_v29, 0.0  ;;  %v136_v63 = vld [vmem:[#allocation8 + $0x38] sm:$0xff] }
  0x3e   :  { %456 = vmatpush.msra.mxu0 %v443_v37  ;;  %v320_v3 = vadd.f32 1.0, %v1026_v0  ;;  %v323_v5 = vmul.f32 -0.5, %v1026_v0  ;;  %v183_v14 = vmax.f32 %v1350_v30, 0.0  ;;  %v334_v26 = vmul.f32 %v1024_v53, %v333_v1  ;;  %v168_v53 = vld [vmem:[#allocation11 + $0x38] sm:$0xff] }
  0x3f   :  { %v229_v15 = vmul.f32 1.442695, %v211_v2  ;;  %v326_v17 = vand.u32 2147483647, %v1026_v0  ;;  %v182_v19 = vmax.f32 %v1362_v43, 0.0  ;;  %v181_v28 = vmax.f32 %v1426_v44, 0.0 }
  0x40   :  { %457 = vmatpush.msra.mxu0 %v442_v22  ;;  %1033 = vlog2.f32 %v320_v3  ;;  %v324_v13 = vadd.f32 1.0, %v323_v5  ;;  %v1028_v4 = vpop.eup %1027  ;;  %vm1447_vm7 = vcmp.lt.f32.partialorder %v335_v60, 0.0004427343  ;;  %v194_v24 = vand.u32 2147483647, %v1443_v11 }
  0x41   :  { %1035 = vpow2.f32 %v233_v6  ;;  %v311_v25 = vadd.f32 1.0, %v1028_v4  ;;  %v314_v29 = vmul.f32 -0.5, %v1028_v4  ;;  %v180_v7 = vmax.f32 %v1432_v47, 0.0 }
  0x42   :  { %1037 = vpow2.f32 %v231_v8  ;;  %v1030_v20 = vpop.eup %1029  ;;  %v325_v31 = vmul.f32 %v1026_v0, %v324_v13  ;;  %v317_v32 = vand.u32 2147483647, %v1028_v4  ;;  %vm1456_vm8 = vcmp.lt.f32.partialorder %v326_v17, 0.0004427343 }
  0x43   :  { %v1032_v41 = vpop.eup %1031  ;;  %v331_v27 = vmul.f32 0.6931472, %v1030_v20  ;;  %1039 = vpow2.f32 %v229_v15  ;;  %v315_v40 = vadd.f32 1.0, %v314_v29  ;;  %v210_v46 = vsub.f32 0.0, %v194_v24  ;;  %v167_v15 = vld [vmem:[#allocation11 + $0x30] sm:$0xff] }
  0x44   :  { %1041 = vlog2.f32 %v311_v25  ;;  %v302_v33 = vadd.f32 1.0, %v1032_v41  ;;  %v305_v10 = vmul.f32 -0.5, %v1032_v41  ;;  %v308_v16 = vand.u32 2147483647, %v1032_v41  ;;  %v135_v24 = vld [vmem:[#allocation8 + $0x30] sm:$0xff] }
  0x45   :  { %v337_v12 = vsel %vm1447_vm7, %v334_v26, %v331_v27  ;;  %vm1462_vm9 = vcmp.lt.f32.partialorder %v317_v32, 0.0004427343  ;;  %v316_v56 = vmul.f32 %v1028_v4, %v315_v40  ;;  %v134_v40 = vld [vmem:[#allocation8 + $0x28] sm:$0xff] }
  0x46   :  { %v1034_v36 = vpop.eup %1033  ;;  %v409_v45 = vadd.f32 %v337_v12, %v185_v23  ;;  %1043 = vlog2.f32 %v302_v33  ;;  %v306_v49 = vadd.f32 1.0, %v305_v10  ;;  %vm1466_vm10 = vcmp.lt.f32.partialorder %v308_v16, 0.0004427343 }
  0x47   :  { %v1036_v35 = vpop.eup %1035  ;;  %v322_v18 = vmul.f32 0.6931472, %v1034_v36  ;;  %v227_v33 = vmul.f32 1.442695, %v210_v46  ;;  %v1480_v36 = vld [vmem:[#allocation10] sm:$0xff] }
  0x48   :  { %v1038_v42 = vpop.eup %1037  ;;  %v293_v39 = vadd.f32 1.0, %v1036_v35  ;;  %v296_v50 = vmul.f32 -0.5, %v1036_v35  ;;  %v425_v51 = vmul.f32 %v409_v45, %v169_v34  ;;  %v299_v61 = vand.u32 2147483647, %v1036_v35 }
  0x49   :  { %v328_v37 = vsel %vm1456_vm8, %v325_v31, %v322_v18  ;;  %v284_v55 = vadd.f32 1.0, %v1038_v42  ;;  %v1040_v57 = vpop.eup %1039  ;;  %v287_v22 = vmul.f32 -0.5, %v1038_v42  ;;  %v307_v3 = vmul.f32 %v1032_v41, %v306_v49  ;;  %v166_v41 = vld [vmem:[#allocation11 + $0x28] sm:$0xff]  ;;  %v165_v18 = vld [vmem:[#allocation11 + $0x20] sm:$0xff] }
  0x4a   :  { %v408_v58 = vadd.f32 %v328_v37, %v184_v9  ;;  %1045 = vlog2.f32 %v293_v39  ;;  %v1042_v59 = vpop.eup %1041  ;;  %v441_v62 = vadd.f32 %v425_v51, %v137_v48  ;;  %v297_v0 = vadd.f32 1.0, %v296_v50  ;;  %v133_v51 = vld [vmem:[#allocation8 + $0x20] sm:$0xff] }
  0x4b   :  { %1047 = vlog2.f32 %v284_v55  ;;  %v313_v1 = vmul.f32 0.6931472, %v1042_v59  ;;  %v288_v8 = vadd.f32 1.0, %v287_v22  ;;  %v290_v2 = vand.u32 2147483647, %v1038_v42  ;;  %v132_v55 = vld [vmem:[#allocation8 + $0x18] sm:$0xff] }
  0x4c   :  { %v424_v60 = vmul.f32 %v408_v58, %v168_v53  ;;  %v1044_v6 = vpop.eup %1043  ;;  %458 = vmatpush.msra.mxu0 %v441_v62  ;;  %v275_v23 = vadd.f32 1.0, %v1040_v57  ;;  %v278_v9 = vmul.f32 -0.5, %v1040_v57  ;;  %vm1472_vm11 = vcmp.lt.f32.partialorder %v299_v61, 0.0004427343 }
  0x4d   :  { %v319_v4 = vsel %vm1462_vm9, %v316_v56, %v313_v1  ;;  %v304_v26 = vmul.f32 0.6931472, %v1044_v6  ;;  %v298_v21 = vmul.f32 %v1036_v35, %v297_v0  ;;  %v281_v25 = vand.u32 2147483647, %v1040_v57 }
  0x4e   :  { %v440_v13 = vadd.f32 %v424_v60, %v136_v63  ;;  %v407_v20 = vadd.f32 %v319_v4, %v183_v14  ;;  %1049 = vlog2.f32 %v275_v23  ;;  %v289_v31 = vmul.f32 %v1038_v42, %v288_v8 }
  0x4f   :  { %v310_v27 = vsel %vm1466_vm10, %v307_v3, %v304_v26  ;;  %v279_v32 = vadd.f32 1.0, %v278_v9  ;;  %vm1484_vm12 = vcmp.lt.f32.partialorder %v290_v2, 0.0004427343  ;;  %1051 = vpow2.f32 %v227_v33 }
  0x50   :  { %v1046_v29 = vpop.eup %1045  ;;  %459 = vmatpush.msra.mxu0 %v440_v13  ;;  %v423_v12 = vmul.f32 %v407_v20, %v167_v15  ;;  %v406_v30 = vadd.f32 %v310_v27, %v182_v19  ;;  %v193_v42 = vand.u32 2147483647, %v1480_v36  ;;  %v164_v19 = vld [vmem:[#allocation11 + $0x18] sm:$0xff]  ;;  %v179_v49 = vmax.f32 %v1437_v52, 0.0  ;;  %v163_v52 = vld [vmem:[#allocation11 + $0x10] sm:$0xff] }
  0x51   :  { %v1048_v34 = vpop.eup %1047  ;;  %v295_v14 = vmul.f32 0.6931472, %v1046_v29  ;;  %v280_v16 = vmul.f32 %v1040_v57, %v279_v32  ;;  %vm282_vm13 = vcmp.lt.f32.partialorder %v281_v25, 0.0004427343  ;;  %v572_v47 = vmul.f32 %v164_v19, %v164_v19 }
  0x52   :  { %v286_v10 = vmul.f32 0.6931472, %v1048_v34  ;;  %v439_v35 = vadd.f32 %v423_v12, %v135_v24  ;;  %v422_v45 = vmul.f32 %v406_v30, %v166_v41  ;;  %v209_v37 = vsub.f32 0.0, %v193_v42  ;;  %v130_v30 = vld [vmem:[#allocation8 + $0x8] sm:$0xff]  ;;  %v161_v42 = vld [vmem:[#allocation11] sm:$0xff] }
  0x53   :  { %v301_v46 = vsel %vm1472_vm11, %v298_v21, %v295_v14  ;;  %v588_v6 = vmul.f32 0.5, %v572_v47  ;;  %v571_v8 = vmul.f32 %v163_v52, %v163_v52  ;;  %v178_v15 = vmax.f32 %v1443_v11, 0.0 }
  0x54   :  { %v405_v43 = vadd.f32 %v301_v46, %v181_v28  ;;  %v292_v48 = vsel %vm1484_vm12, %v289_v31, %v286_v10  ;;  %v1050_v39 = vpop.eup %1049  ;;  %460 = vmatpush.msra.mxu0 %v439_v35  ;;  %v438_v50 = vadd.f32 %v422_v45, %v134_v40  ;;  %v225_v58 = vmul.f32 1.442695, %v209_v37  ;;  %v162_v31 = vld [vmem:[#allocation11 + $0x8] sm:$0xff] }
  0x55   :  { %v404_v53 = vadd.f32 %v292_v48, %v180_v7  ;;  %v277_v44 = vmul.f32 0.6931472, %v1050_v39  ;;  %v1052_v56 = vpop.eup %1051  ;;  %v131_v7 = vld [vmem:[#allocation8 + $0x10] sm:$0xff]  ;;  %v587_v29 = vmul.f32 0.5, %v571_v8  ;;  %v177_v40 = vmax.f32 %v1480_v36, 0.0 }
  0x56   :  { %v421_v54 = vmul.f32 %v405_v43, %v165_v18  ;;  %461 = vmatpush.msra.mxu0 %v438_v50  ;;  %v266_v63 = vadd.f32 1.0, %v1052_v56  ;;  %v269_v0 = vmul.f32 -0.5, %v1052_v56  ;;  %v272_v2 = vand.u32 2147483647, %v1052_v56  ;;  %v129_v50 = vld [vmem:[#allocation8] sm:$0xff] }
  0x57   :  { %v420_v28 = vmul.f32 %v404_v53, %v164_v19  ;;  %1053 = vlog2.f32 %v404_v53  ;;  %v283_v57 = vsel %vm282_vm13, %v280_v16, %v277_v44  ;;  %v570_v35 = vmul.f32 %v162_v31, %v162_v31 }
  0x58   :  { %v437_v61 = vadd.f32 %v421_v54, %v133_v51  ;;  %v403_v62 = vadd.f32 %v283_v57, %v179_v49  ;;  %1055 = vpow2.f32 %v225_v58  ;;  %v270_v3 = vadd.f32 1.0, %v269_v0 }
  0x59   :  { %v436_v59 = vadd.f32 %v420_v28, %v132_v55  ;;  %vm273_vm14 = vcmp.lt.f32.partialorder %v272_v2, 0.0004427343  ;;  %v668_v18 = vlaneseq  ;;  %v586_v39 = vmul.f32 0.5, %v570_v35  ;;  %v450_v28 = vld [vmem:[#allocation5] sm:$0xff] }
  0x5a   :  { %462 = vmatpush.msra.mxu0 %v437_v61  ;;  %v419_v22 = vmul.f32 %v403_v62, %v163_v52  ;;  %1057 = vlog2.f32 %v403_v62  ;;  %v271_v4 = vmul.f32 %v1052_v56, %v270_v3  ;;  %v569_v58 = vmul.f32 %v161_v42, %v161_v42 }
  0x5b   :  { %1059 = vlog2.f32 %v266_v63  ;;  %v476_v16 = vmul.f32 %v436_v59, %v436_v59  ;;  %v1502_v36 = vand.u32 127, %v668_v18 }
  0x5c   :  { %463 = vmatpush.msra.mxu0 %v436_v59  ;;  %v435_v1 = vadd.f32 %v419_v22, %v131_v7  ;;  %v585_v47 = vmul.f32 0.5, %v569_v58 }
  0x5d   :  { %v1054_v60 = vpop.eup %1053  ;;  %v492_v56 = vmul.f32 0.5, %v476_v16  ;;  %vm673_vm0 = vcmp.lt.s32.totalorder %v1502_v36, 16 }
  0x5e   :  { %v528_v5 = vmul.f32 0.6931472, %v1054_v60  ;;  %464 = vmatpush.msra.mxu0 %v435_v1  ;;  %v1056_v23 = vpop.eup %1055  ;;  %v475_v19 = vmul.f32 %v435_v1, %v435_v1 }
  0x5f   :  { %v257_v26 = vadd.f32 1.0, %v1056_v23  ;;  %v260_v17 = vmul.f32 -0.5, %v1056_v23  ;;  %v263_v33 = vand.u32 2147483647, %v1056_v23  ;;  %v508_v7 = vsub.f32 -0.9189385, %v492_v56 }
  0x60   :  { %v556_v9 = vsub.f32 -0.9189385, %v528_v5  ;;  %v1058_v13 = vpop.eup %1057  ;;  %v491_v54 = vmul.f32 0.5, %v475_v19 }
  0x61   :  { %v1060_v20 = vpop.eup %1059  ;;  %v526_v25 = vmul.f32 0.6931472, %v1058_v13  ;;  %1061 = vlog2.f32 %v257_v26  ;;  %v261_v27 = vadd.f32 1.0, %v260_v17  ;;  %vm264_vm15 = vcmp.lt.f32.partialorder %v263_v33, 0.0004427343 }
  0x62   :  { %v1499_v21 = vsub.f32 %v556_v9, %v588_v6  ;;  %v268_v24 = vmul.f32 0.6931472, %v1060_v20  ;;  %v507_v62 = vsub.f32 -0.9189385, %v491_v54 }
  0x63   :  { %v555_v41 = vsub.f32 -0.9189385, %v526_v25  ;;  %v262_v14 = vmul.f32 %v1056_v23, %v261_v27  ;;  %v693_v23 = vsel %vm673_vm0, %v508_v7, 0.0 }
  0x64   :  { %v274_v32 = vsel %vm273_vm14, %v271_v4, %v268_v24  ;;  %v692_v3 = vsel %vm673_vm0, %v507_v62, 0.0  ;;  %v709_v26 = vsel %vm673_vm0, %v1499_v21, 0.0 }
  0x65   :  { %v603_v34 = vsub.f32 %v555_v41, %v587_v29  ;;  %v402_v12 = vadd.f32 %v274_v32, %v178_v15  ;;  %v822_v29 = vld [vmem:[%s1549_s5] sm:$0x1] }
  0x66   :  { %v825_v24 = vand.u32 2147483647, %v822_v29 }
  0x67   :  { %v418_v11 = vmul.f32 %v402_v12, %v162_v31  ;;  %1063 = vlog2.f32 %v402_v12  ;;  %v1062_v38 = vpop.eup %1061  ;;  %v708_v9 = vsel %vm673_vm0, %v603_v34, 0.0 }
  0x68   :  { %v259_v45 = vmul.f32 0.6931472, %v1062_v38  ;;  %v826_v41 = vsub.f32 0.0, %v825_v24 }
  0x69   :  { %v434_v10 = vadd.f32 %v418_v11, %v130_v30 }
  0x6a   :  { %v265_v43 = vsel %vm264_vm15, %v262_v14, %v259_v45  ;;  %v827_v27 = vmul.f32 1.442695, %v826_v41  ;;  %v824_v14 = vmax.f32 %v822_v29, 0.0 }
  0x6b   :  { %465 = vmatpush.msra.mxu0 %v434_v10  ;;  %v474_v46 = vmul.f32 %v434_v10, %v434_v10  ;;  %v401_v48 = vadd.f32 %v265_v43, %v177_v40  ;;  %v823_v10 = vld [vmem:[%s1550_s6] sm:$0x1]  ;;  %s1257_s6 = smov [#allocation14]  }
  0x6c   :  { %s952_s11 = sshll.u32 %s1257_s6, 4  ;;  %s953_s11 = int_to_ptr.vmem [resolvable:$true] %s952_s11 }
  0x6d   :  { %v1064_v49 = vpop.eup %1063  ;;  %v490_v51 = vmul.f32 0.5, %v474_v46  ;;  %v417_v37 = vmul.f32 %v401_v48, %v161_v42  ;;  %1065 = vlog2.f32 %v401_v48  ;;  %v821_v46 = vld [vmem:[%s1548_s4] sm:$0x1] }
  0x6e   :  { %v524_v53 = vmul.f32 0.6931472, %v1064_v49  ;;  %1067 = vpow2.f32 %v827_v27 }
  0x6f   :  { %v433_v44 = vadd.f32 %v417_v37, %v129_v50  ;;  %v506_v61 = vsub.f32 -0.9189385, %v490_v51  ;;  %v853_v51 = vmul.f32 %v823_v10, %v823_v10 }
  0x70   :  { %v554_v55 = vsub.f32 -0.9189385, %v524_v53 }
  0x71   :  { %466 = vmatpush.msra.mxu0 %v433_v44  ;;  %v473_v57 = vmul.f32 %v433_v44, %v433_v44  ;;  %v691_v22 = vsel %vm673_vm0, %v506_v61, 0.0 }
  0x72   :  { %v602_v52 = vsub.f32 %v554_v55, %v586_v39  ;;  %467 = vmatmul.f32.vlgmr.msra.gmra.mxu0 %v450_v28  ;;  %v854_v55 = vmul.f32 0.5, %v853_v51 }
  0x73   :  { %v1066_v59 = vpop.eup %1065  ;;  %v489_v63 = vmul.f32 0.5, %v473_v57 }
  0x74   :  { %v522_v0 = vmul.f32 0.6931472, %v1066_v59  ;;  %v707_v6 = vsel %vm673_vm0, %v602_v52, 0.0  ;;  %v1068_v31 = vpop.eup %1067 }
  0x75   :  { %v505_v60 = vsub.f32 -0.9189385, %v489_v63  ;;  %v829_v32 = vadd.f32 1.0, %v1068_v31  ;;  %v832_v33 = vmul.f32 -0.5, %v1068_v31  ;;  %v835_v30 = vand.u32 2147483647, %v1068_v31 }
  0x76   :  { %v553_v1 = vsub.f32 -0.9189385, %v522_v0 }
  0x77   :  { %v690_v5 = vsel %vm673_vm0, %v505_v60, 0.0  ;;  %1069 = vlog2.f32 %v829_v32  ;;  %v833_v34 = vadd.f32 1.0, %v832_v33  ;;  %vm836_vm1 = vcmp.lt.f32.partialorder %v835_v30, 0.0004427343 }
  0x78   :  { %v601_v8 = vsub.f32 %v553_v1, %v585_v47  ;;  %v874_v2 = vadd.f32 %v691_v22, %v690_v5 }
  0x79   :  { %v834_v21 = vmul.f32 %v1068_v31, %v833_v34 }
  0x7a   :  { %v706_v13 = vsel %vm673_vm0, %v601_v8, 0.0  ;;  %v875_v15 = vadd.f32 %v874_v2, %v692_v3 }
  0x7b   :  { %v912_v4 = vadd.f32 %v707_v6, %v706_v13 }
  0x7c   :  { %v876_v17 = vadd.f32 %v875_v15, %v693_v23 }
  0x7d   :  { %v913_v20 = vadd.f32 %v912_v4, %v708_v9  ;;  %v1070_v12 = vpop.eup %1069 }
  0x7e   :  { %v831_v11 = vmul.f32 0.6931472, %v1070_v12  ;;  %v889_v35 = vrot.slane %v876_v17, 4 }
  0x7f   :  { %v914_v25 = vadd.f32 %v913_v20, %v709_v26 }
  0x80   :  { %v837_v38 = vsel %vm836_vm1, %v834_v21, %v831_v11  ;;  %v890_v42 = vadd.f32 %v889_v35, %v876_v17 }
  0x81   :  { %v838_v40 = vadd.f32 %v837_v38, %v824_v14  ;;  %v927_v18 = vrot.slane %v914_v25, 4 }
  0x82   :  { %v891_v48 = vrot.slane %v890_v42, 2 }
  0x83   :  { %1071 = vlog2.f32 %v838_v40  ;;  %v839_v45 = vmul.f32 %v838_v40, %v823_v10  ;;  %v928_v19 = vadd.f32 %v927_v18, %v914_v25 }
  0x84   :  { %v892_v53 = vadd.f32 %v891_v48, %v890_v42 }
  0x85   :  { %v840_v43 = vadd.f32 %v839_v45, %v821_v46  ;;  %v929_v39 = vrot.slane %v928_v19, 2 }
  0x86   :  { %v893_v44 = vrot.slane %v892_v53, 1 }
  0x87   :  { %v847_v16 = vmul.f32 %v840_v43, %v840_v43  ;;  %v930_v54 = vadd.f32 %v929_v39, %v928_v19  ;;  %v843_v47 = vperm.slane %v840_v43, 0 }
  0x88   :  { %v894_v61 = vadd.f32 %v893_v44, %v892_v53 }
  0x89   :  { %v1072_v49 = vpop.eup %1071  ;;  %v848_v37 = vmul.f32 0.5, %v847_v16  ;;  %v931_v56 = vrot.slane %v930_v54, 1 }
  0x8a   :  { %v851_v50 = vmul.f32 0.6931472, %v1072_v49 }
  0x8b   :  { %v849_v58 = vsub.f32 -0.9189385, %v848_v37  ;;  %v932_v59 = vadd.f32 %v931_v56, %v930_v54 }
  0x8c   :  { %v852_v28 = vsub.f32 -0.9189385, %v851_v50 }
  0x8d   :  { %v856_v57 = vsel %vm673_vm0, %v849_v58, 0.0 }
  0x8e   :  { %v855_v52 = vsub.f32 %v852_v28, %v854_v55  ;;  %v895_v62 = vadd.f32 %v894_v61, %v856_v57 }
  0x90   :  { %v857_v63 = vsel %vm673_vm0, %v855_v52, 0.0  ;;  %934 = vst [vmem:[#allocation14] sm:$0x1] %v895_v62 }
  0x91   :  { %v933_v0 = vadd.f32 %v932_v59, %v857_v63  ;;  %957 = dma.vmem_to_hbm [thread:$0]  %s953_s11, 16, %s955_s13, [#allocation15]  }
  0x93   :  { %935 = vst [vmem:[#allocation16] sm:$0x1] %v933_v0 }
  0x94   :  { %968 = dma.vmem_to_hbm [thread:$0]  %s964_s15, 16, %s966_s18, [#allocation15]  }
  0xef   :  { %v468_v7 = vpop.f32.mrf.mxu0 }
  0xf0   :  { %v845_v22 = vadd.f32 %v843_v47, %v468_v7 }
  0xf2   :  { %846 = vst [vmem:[#allocation13] sm:$0xff] %v845_v22 }
  0xf3   :  { %946 = dma.vmem_to_hbm [thread:$0]  %s942_s9, 128, %s944_s21, [#allocation7]  }
  0xf4   :  { %1247 = dma.done.wait [#allocation7], 128  }
  0xf5   :  { %1248 = vsyncadd [#allocation7], 4294967168 }
  0xf6   :  { %1249 = dma.done.wait [#allocation15], 32  }
  0xf7   :  { %1250 = vsyncadd [#allocation15], 4294967264 }
  0xf8   :  { %981 = vsyncpa [#allocation6], 1 }
  0xf9   :  { %982 = vsyncpa [#allocation9], 1 }
  0xfa   :  { %983 = vsyncpa [#allocation12], 1 }
  0xfb   :  { %984 = vsyncpa [#allocation7], 1 }
  0xfc   :  { %985 = vsyncpa [#allocation15], 1 }

</bundles_post_ra>
